<compile_context>
chip_gen: v7x
topology: tpu7x:2x2x1
jax: 0.10.0
libtpu: 0.0.40
codegen_flags: <defaults>
</compile_context>

<pallas_src>
import jax
import jax.numpy as jnp
from jax.experimental import pallas as pl
from jax.experimental.pallas import tpu as pltpu


HIDDEN = 128        # embed_dim / hidden_dim in the PyTorch module
NUM_HEADS = 4       # documentation only: seq_len == 1 makes head mixing a no-op
MAX_TILE_B = 2048   # rows per grid step; double-buffered tiles stay far below the
                    # v7x 32 MiB scoped-VMEM default while reaching the DMA plateau


def _round_up(x, m):
    return ((x + m - 1) // m) * m


def _choose_tile_b(B):
    """Adaptive batch tile: multiple of 8, <= MAX_TILE_B, an even number (>= 2) of
    grid steps once there is enough work (megacore), small padding waste."""
    if B < 64:
        return _round_up(max(B, 1), 8)
    n_tiles = max(2, pl.cdiv(B, MAX_TILE_B))
    if n_tiles % 2:
        n_tiles += 1
    return _round_up(pl.cdiv(B, n_tiles), 8)


def qnet_fused_kernel(x_ref, wf_ref, bf_ref, w2_ref, b2_ref, out_ref):
    # (tile_b, state_dim)bf16 @ (state_dim, 128)bf16 -> f32 accumulate, + f32 bias, ReLU
    h = jnp.dot(x_ref[...], wf_ref[...], preferred_element_type=jnp.float32) + bf_ref[...]
    h = jnp.maximum(h, 0.0).astype(jnp.bfloat16)
    # (tile_b, 128)bf16 @ (128, action_dim)bf16 -> f32 accumulate, + f32 bias
    out_ref[...] = (jnp.dot(h, w2_ref[...], preferred_element_type=jnp.float32)
                    + b2_ref[...]).astype(out_ref.dtype)


def qnetwork_attention_forward(state, params, *, tile_b=None):
    """state: (B, state_dim) f32.  Returns (B, action_dim) f32 Q-values."""
    B, state_dim = state.shape
    action_dim = params["w2"].shape[1]

    # ---- host-side (traced, static-shape) param prep -------------------------
    # Fold the purely-linear prefix in f32: embed -> v_proj -> out_proj -> fc1.
    # Exact only because seq_len == 1 (softmax == 1) and MHA dropout == 0.
    w_fused = params["w_emb"] @ params["w_v"] @ params["w_o"] @ params["w1"]
    b_fused = (((params["b_emb"] @ params["w_v"] + params["b_v"]) @ params["w_o"]
                + params["b_o"]) @ params["w1"] + params["b1"])

    # bf16 MXU operands; biases and accumulation stay f32.
    x_bf = state.astype(jnp.bfloat16)
    wf_bf = w_fused.astype(jnp.bfloat16)
    w2_bf = params["w2"].astype(jnp.bfloat16)
    bf = b_fused.astype(jnp.float32)
    b2 = params["b2"].astype(jnp.float32)

    # ---- batch tiling ---------------------------------------------------------
    if tile_b is None:
        tile_b = _choose_tile_b(B)
    b_pad = _round_up(B, tile_b)
    if b_pad != B:
        x_bf = jnp.pad(x_bf, ((0, b_pad - B), (0, 0)))

    grid = (b_pad // tile_b,)
    flops = 2 * b_pad * (state_dim * HIDDEN + HIDDEN * action_dim)
    bytes_accessed = (2 * (b_pad * state_dim + state_dim * HIDDEN + HIDDEN * action_dim)
                      + 4 * (HIDDEN + action_dim + b_pad * action_dim))

    out = pl.pallas_call(
        qnet_fused_kernel,
        out_shape=jax.ShapeDtypeStruct((b_pad, action_dim), jnp.float32),
        grid_spec=pltpu.PrefetchScalarGridSpec(
            num_scalar_prefetch=0,
            grid=grid,
            in_specs=[
                pl.BlockSpec((tile_b, state_dim), lambda i: (i, 0)),    # activations: tiled
                pl.BlockSpec((state_dim, HIDDEN), lambda i: (0, 0)),    # fused weight: resident
                pl.BlockSpec((1, HIDDEN),         lambda i: (0, 0)),    # fused bias:   resident
                pl.BlockSpec((HIDDEN, action_dim), lambda i: (0, 0)),   # fc2 weight:   resident
                pl.BlockSpec((1, action_dim),      lambda i: (0, 0)),   # fc2 bias:     resident
            ],
            out_specs=pl.BlockSpec((tile_b, action_dim), lambda i: (i, 0)),  # narrow writeback
        ),
        compiler_params=pltpu.CompilerParams(
            dimension_semantics=("parallel",)),
        cost_estimate=pl.CostEstimate(
            flops=flops, transcendentals=0, bytes_accessed=bytes_accessed),
    )(x_bf, wf_bf, bf, w2_bf, b2)

    return out if b_pad == B else out[:B]


def init_params(key, state_dim, action_dim):
    """Deterministic synthetic init (PyTorch-style fan-in init, weights stored (in, out))."""
    ks = jax.random.split(key, 12)

    def lin(k_w, k_b, fan_in, fan_out):
        bound = 1.0 / jnp.sqrt(fan_in)
        w = jax.random.uniform(k_w, (fan_in, fan_out), jnp.float32, -bound, bound)
        b = jax.random.uniform(k_b, (1, fan_out), jnp.float32, -bound, bound)
        return w, b

    w_emb, b_emb = lin(ks[0], ks[1], state_dim, HIDDEN)
    # value slice of nn.MultiheadAttention.in_proj (only slice affecting the output here)
    w_v, b_v = lin(ks[2], ks[3], HIDDEN, HIDDEN)
    w_o, b_o = lin(ks[4], ks[5], HIDDEN, HIDDEN)
    w1, b1 = lin(ks[6], ks[7], HIDDEN, HIDDEN)
    w2, b2 = lin(ks[8], ks[9], HIDDEN, action_dim)

    return dict(w_emb=w_emb, b_emb=b_emb, w_v=w_v, b_v=b_v,
                w_o=w_o, b_o=b_o, w1=w1, b1=b1, w2=w2, b2=b2)


def reference_forward(state, p):
    """Pure-JAX f32 reference mirroring the PyTorch forward (seq_len == 1 attention)."""
    e = state @ p["w_emb"] + p["b_emb"]
    v = e @ p["w_v"] + p["b_v"]          # softmax over a single key == 1.0 exactly
    attn = v @ p["w_o"] + p["b_o"]
    h = jnp.maximum(attn @ p["w1"] + p["b1"], 0.0)
    return h @ p["w2"] + p["b2"]


if __name__ == "__main__":
    key = jax.random.PRNGKey(0)
    k_state, k_params, k_state2 = jax.random.split(key, 3)

    state_dim, action_dim = 16, 4
    params = init_params(k_params, state_dim, action_dim)

    # Small batch: single-tile path.
    B = 8
    state = jax.random.normal(k_state, (B, state_dim), jnp.float32)
    q_values = jax.block_until_ready(qnetwork_attention_forward(state, params))
    ref = reference_forward(state, params)
    assert q_values.shape == (B, action_dim)
    # bf16 MXU operands with f32 accumulation: loosened tolerance vs f32 reference.
    assert jnp.allclose(q_values, ref, rtol=3e-2, atol=3e-2), "kernel/reference mismatch (B=8)"

    # Medium batch: exercises adaptive tiling, batch padding and the 2-step parallel grid.
    B2 = 300
    state2 = jax.random.normal(k_state2, (B2, state_dim), jnp.float32)
    q2 = jax.block_until_ready(qnetwork_attention_forward(state2, params))
    ref2 = reference_forward(state2, params)
    assert q2.shape == (B2, action_dim)
    assert jnp.allclose(q2, ref2, rtol=3e-2, atol=3e-2), "kernel/reference mismatch (B=300)"

    print("KERNEL_OK")
</pallas_src>

<mosaic_0001>
module attributes {stable_mosaic.version = 11 : i64} {
  func.func @qnet_fused_kernel(%arg0: i32, %arg1: memref<8x16xbf16, #tpu.memory_space<vmem>>, %arg2: memref<16x128xbf16, #tpu.memory_space<vmem>>, %arg3: memref<1x128xf32, #tpu.memory_space<vmem>>, %arg4: memref<128x4xbf16, #tpu.memory_space<vmem>>, %arg5: memref<1x4xf32, #tpu.memory_space<vmem>>, %arg6: memref<8x4xf32, #tpu.memory_space<vmem>>) attributes {dimension_semantics = [#tpu.dimension_semantics<parallel>], iteration_bounds = array<i64: 1>, scalar_prefetch = 0 : i64, scratch_operands = 0 : i64, tpu.core_type = #tpu.core_type<tc>, window_params = [{transform_indices = @transform_0, window_bounds = array<i64: 8, 16>}, {pipeline_mode = #tpu.pipeline_mode<synchronous>, transform_indices = @transform_1, window_bounds = array<i64: 16, 128>}, {pipeline_mode = #tpu.pipeline_mode<synchronous>, transform_indices = @transform_2, window_bounds = array<i64: 1, 128>}, {pipeline_mode = #tpu.pipeline_mode<synchronous>, transform_indices = @transform_3, window_bounds = array<i64: 128, 4>}, {pipeline_mode = #tpu.pipeline_mode<synchronous>, transform_indices = @transform_4, window_bounds = array<i64: 1, 4>}, {transform_indices = @transform_5, window_bounds = array<i64: 8, 4>}]} {
    %c0 = arith.constant 0 : index
    %c0_0 = arith.constant 0 : index
    %0 = vector.load %arg1[%c0, %c0_0] : memref<8x16xbf16, #tpu.memory_space<vmem>>, vector<8x16xbf16>
    %c0_1 = arith.constant 0 : index
    %c0_2 = arith.constant 0 : index
    %1 = vector.load %arg2[%c0_1, %c0_2] : memref<16x128xbf16, #tpu.memory_space<vmem>>, vector<16x128xbf16>
    %cst = arith.constant dense<0.000000e+00> : vector<8x128xf32>
    %2 = tpu.matmul %0, %1, %cst {dimension_numbers = #tpu.dot_dimension_numbers<[1], [0], [0], [1], [0, 0, 1, 1], [], []>} : vector<8x16xbf16>, vector<16x128xbf16>, vector<8x128xf32> -> vector<8x128xf32>
    %c0_3 = arith.constant 0 : index
    %c0_4 = arith.constant 0 : index
    %3 = vector.load %arg3[%c0_3, %c0_4] : memref<1x128xf32, #tpu.memory_space<vmem>>, vector<1x128xf32>
    %4 = vector.broadcast %3 : vector<1x128xf32> to vector<8x128xf32>
    %5 = arith.addf %2, %4 : vector<8x128xf32>
    %cst_5 = arith.constant 0.000000e+00 : f32
    %6 = vector.broadcast %cst_5 : f32 to vector<8x128xf32>
    %7 = arith.maximumf %5, %6 : vector<8x128xf32>
    %8 = arith.truncf %7 : vector<8x128xf32> to vector<8x128xbf16>
    %c0_6 = arith.constant 0 : index
    %c0_7 = arith.constant 0 : index
    %9 = vector.load %arg4[%c0_6, %c0_7] : memref<128x4xbf16, #tpu.memory_space<vmem>>, vector<128x4xbf16>
    %cst_8 = arith.constant dense<0.000000e+00> : vector<8x4xf32>
    %10 = tpu.matmul %8, %9, %cst_8 {dimension_numbers = #tpu.dot_dimension_numbers<[1], [0], [0], [1], [0, 0, 1, 1], [], []>} : vector<8x128xbf16>, vector<128x4xbf16>, vector<8x4xf32> -> vector<8x4xf32>
    %c0_9 = arith.constant 0 : index
    %c0_10 = arith.constant 0 : index
    %11 = vector.load %arg5[%c0_9, %c0_10] : memref<1x4xf32, #tpu.memory_space<vmem>>, vector<1x4xf32>
    %12 = vector.broadcast %11 : vector<1x4xf32> to vector<8x4xf32>
    %13 = arith.addf %10, %12 : vector<8x4xf32>
    %c0_11 = arith.constant 0 : index
    %c0_12 = arith.constant 0 : index
    %14 = vector.load %arg6[%c0_11, %c0_12] : memref<8x4xf32, #tpu.memory_space<vmem>>, vector<8x4xf32>
    tpu.vector_store %arg6[%c0_11, %c0_12], %13 {strides = array<i32>} : memref<8x4xf32, #tpu.memory_space<vmem>>, vector<8x4xf32>,
    return
  }
  func.func @transform_0(%arg0: i32) -> (i32, i32) {
    %c0_i32 = arith.constant 0 : i32
    %c0_i32_0 = arith.constant 0 : i32
    return %arg0, %c0_i32 : i32, i32
  }
  func.func @transform_1(%arg0: i32) -> (i32, i32) {
    %c0_i32 = arith.constant 0 : i32
    %c0_i32_0 = arith.constant 0 : i32
    %c0_i32_1 = arith.constant 0 : i32
    return %c0_i32, %c0_i32_0 : i32, i32
  }
  func.func @transform_2(%arg0: i32) -> (i32, i32) {
    %c0_i32 = arith.constant 0 : i32
    %c0_i32_0 = arith.constant 0 : i32
    %c0_i32_1 = arith.constant 0 : i32
    return %c0_i32, %c0_i32_0 : i32, i32
  }
  func.func @transform_3(%arg0: i32) -> (i32, i32) {
    %c0_i32 = arith.constant 0 : i32
    %c0_i32_0 = arith.constant 0 : i32
    %c0_i32_1 = arith.constant 0 : i32
    return %c0_i32, %c0_i32_0 : i32, i32
  }
  func.func @transform_4(%arg0: i32) -> (i32, i32) {
    %c0_i32 = arith.constant 0 : i32
    %c0_i32_0 = arith.constant 0 : i32
    %c0_i32_1 = arith.constant 0 : i32
    return %c0_i32, %c0_i32_0 : i32, i32
  }
  func.func @transform_5(%arg0: i32) -> (i32, i32) {
    %c0_i32 = arith.constant 0 : i32
    %c0_i32_0 = arith.constant 0 : i32
    return %arg0, %c0_i32 : i32, i32
  }
}

</mosaic_0001>

<bundles_post_ra>
// kernel: tpu_custom_call.1
= control target key start
LH: loop header
LB: loop body
LE: loop exit
PB: predicated region body
PF: predicated region fallthrough
CT: control target
= control target key end

     0   :  { %v260_v0 = vmov 0.0   ;;  %vm261_vm0 = vmmov 0   ;;  %vm37_vm1 = vcmask 130048   ;;  %vm194_vm2 = vcmask 31744   ;;  %s331_s1 = inlined_call_operand.vmem [shape: bf16[16,128], index: 1, kind: input, shape index: {}]   ;;  %s332_s0 = inlined_call_operand.vmem [shape: bf16[8,16], index: 0, kind: input, shape index: {}]   ;;  %s333_s3 = inlined_call_operand.vmem [shape: bf16[128,4], index: 3, kind: input, shape index: {}]   ;;  %s334_s2 = inlined_call_operand.vmem [shape: f32[1,128], index: 2, kind: input, shape index: {}]   ;;  %s335_s4 = inlined_call_operand.vmem [shape: f32[1,4], index: 4, kind: input, shape index: {}]   ;;  %s336_s5 = inlined_call_operand.vmem [shape: f32[8,4], index: 5, kind: output, shape index: {}]  }
   0x1   :  { %223 = vmatprep.subr.bf16.mxu0 %v260_v0  ;;  %v251_v1 = vld [vmem:[%s331_s1] sm:$0xff]   ;;  %225 = vmatprep.mubr.msk.bf16.mxu0 %vm261_vm0, %v260_v0  ;;  %v253_v4 = vld [vmem:[%s333_s3 + $0x8] sm:$0xff]   ;;  %v254_v5 = vld [vmem:[%s333_s3 + $0x10] sm:$0xff]  }
   0x2   :  { %v21_v2 = vld [vmem:[%s332_s0] sm:$0xf]  ;;  %229 = vmatprep.subr.bf16.mxu1 %v260_v0  ;;  %245 = vmatprep.mubr.msk.bf16.mxu1 %vm261_vm0, %v260_v0  ;;  %v255_v6 = vld [vmem:[%s333_s3 + $0x18] sm:$0xff]   ;;  %v257_v8 = vld [vmem:[%s333_s3 + $0x28] sm:$0xff]  }
   0x3   :  { %224 = vmatpush3.bf16.msra.mxu0 %v251_v1  ;;  %v252_v3 = vld [vmem:[%s333_s3] sm:$0xff]   ;;  %v258_v9 = vld [vmem:[%s333_s3 + $0x30] sm:$0xff]   ;;  %v259_v10 = vld [vmem:[%s333_s3 + $0x38] sm:$0xff]  }
   0x4   :  { %230 = vmatpush3.bf16.msra.mxu1 %v252_v3  ;;  %v256_v7 = vld [vmem:[%s333_s3 + $0x20] sm:$0xff]  }
   0x5   :  { %231 = vmatprep.subr.bf16.mxu1 %v260_v0  ;;  %v200_v11 = vld [vmem:[%s334_s2] ss:$0 sm:$0xff] }
   0x6   :  { %226 = vmatmul.mubr.msk.bf16.vlgmr.msra.gmra.mrb[0].mxu0 %vm37_vm1, %v21_v2  ;;  %v203_v19 = vld [vmem:[%s335_s4] ss:$0 sm:$0xff] }
   0x8   :  { %232 = vmatpush3.bf16.msra.mxu1 %v253_v4 }
   0x9   :  { %233 = vmatprep.subr.bf16.mxu1 %v260_v0 }
   0xc   :  { %234 = vmatpush3.bf16.msra.mxu1 %v254_v5 }
   0xd   :  { %235 = vmatprep.subr.bf16.mxu1 %v260_v0 }
  0x10   :  { %236 = vmatpush3.bf16.msra.mxu1 %v255_v6 }
  0x11   :  { %237 = vmatprep.subr.bf16.mxu1 %v260_v0 }
  0x14   :  { %238 = vmatpush3.bf16.msra.mxu1 %v256_v7 }
  0x15   :  { %239 = vmatprep.subr.bf16.mxu1 %v260_v0 }
  0x18   :  { %240 = vmatpush3.bf16.msra.mxu1 %v257_v8 }
  0x19   :  { %241 = vmatprep.subr.bf16.mxu1 %v260_v0 }
  0x1c   :  { %242 = vmatpush3.bf16.msra.mxu1 %v258_v9 }
  0x1d   :  { %243 = vmatprep.subr.bf16.mxu1 %v260_v0 }
  0x20   :  { %244 = vmatpush3.bf16.msra.mxu1 %v259_v10 }
  0xd9   :  { %v75_v12 = vpop.f32.mrb[0].mxu0 }
  0xda   :  { %v76_v13 = vadd.f32 %v200_v11, %v75_v12  ;;  %v227_v14 = vpop.f32.mrb[1].mxu0 }
  0xdb   :  { %v78_v15 = vpop.f32.mrb[2].mxu0 }
  0xdc   :  { %v81_v16 = vmax.f32 %v76_v13, 0.0  ;;  %v228_v17 = vpop.f32.mrb[3].mxu0 }
  0xde   :  { %v82_v18 = vpack.c.bf16 %v81_v16, %v81_v16 }
  0xe0   :  { %246 = vmatmul.mubr.bf16.vlgmr.msra.gmra.mrb[0].mxu1 %v82_v18 }
 0x1b3   :  { %v188_v20 = vpop.f32.mrb[0].mxu1 }
 0x1b4   :  { %v189_v21 = vadd.f32 %v203_v19, %v188_v20  ;;  %v247_v22 = vpop.f32.mrb[1].mxu1 }
 0x1b5   :  { %v191_v23 = vpop.f32.mrb[2].mxu1 }
 0x1b6   :  { %195 = vst.msk [vmem:[%s336_s5] sm:$0xff] %vm194_vm2, %v189_v21  ;;  %v248_v24 = vpop.f32.mrb[3].mxu1 }

</bundles_post_ra>
